<compile_context>
chip_gen: v7x
topology: tpu7x:2x2x1
jax: 0.10.0
libtpu: 0.0.40
codegen_flags: <defaults>
</compile_context>

<pallas_src>
import functools

import jax
import jax.numpy as jnp
from jax.experimental import pallas as pl
from jax.experimental.pallas import tpu as pltpu


def _round_up(x, m):
    return ((x + m - 1) // m) * m


def _sublane_multiple(dtype):
    itemsize = jnp.dtype(dtype).itemsize
    if itemsize >= 4:
        return 8
    if itemsize == 2:
        return 16
    return 32


def _vmem_limit_bytes():
    """~75% of per-core VMEM; conservative 48 MiB fallback (v7x per-TC)."""
    cap = None
    try:
        info = pltpu.get_tpu_info()
        cap = getattr(info, "vmem_capacity_bytes", None)
    except Exception:
        cap = None
    if not cap:
        cap = 64 * 1024 * 1024
    return int(cap) * 3 // 4


# ----------------------------------------------------------------------------
# Fused kernel:  (optional LayerNorm over D)  ->  x @ w + b
# ----------------------------------------------------------------------------
def _fused_norm_linear_kernel(x_ref, g_ref, bt_ref, w_ref, b_ref, o_ref,
                              xn_ref, *, eps, apply_norm, mxu_dtype):
    # Norm is hoisted: computed once per row tile (j == 0) into VMEM scratch
    # and reused for every output-column step.
    @pl.when(pl.program_id(1) == 0)
    def _():
        if apply_norm:
            x = x_ref[...].astype(jnp.float32)                    # (tm, D)
            mean = jnp.mean(x, axis=-1, keepdims=True)
            xc = x - mean
            var = jnp.mean(xc * xc, axis=-1, keepdims=True)       # two-pass var
            y = xc * jax.lax.rsqrt(var + eps)                     # EUP rsqrt
            y = y * g_ref[...].astype(jnp.float32) + bt_ref[...].astype(jnp.float32)
            xn_ref[...] = y.astype(mxu_dtype)
        else:
            xn_ref[...] = x_ref[...].astype(mxu_dtype)             # no f32 detour

    acc = jnp.dot(xn_ref[...], w_ref[...],
                  preferred_element_type=jnp.float32)              # bf16 MXU
    acc = acc + b_ref[...].astype(jnp.float32)
    o_ref[...] = acc.astype(o_ref.dtype)


def _norm_linear(x2, gamma, beta, w, b, *, eps=1e-5, apply_norm=True,
                 mxu_dtype=jnp.bfloat16, rows_tile=None):
    """x2: (R, D), w: (D, H), b: (H,) -> (R, H). Optionally LayerNorm(D) first."""
    R, D = x2.shape
    Dw, H = w.shape
    assert Dw == D
    out_dtype = x2.dtype

    vmem_limit = _vmem_limit_bytes()
    budget = int(vmem_limit * 0.7)          # leave room for Mosaic internals

    # --- row (M) tile: dtype-correct sublane multiple, bigger on big-VMEM ----
    sub = _sublane_multiple(x2.dtype)
    if rows_tile is None:
        rows_tile = 512 if budget >= (64 << 20) else 256
    tm = min(rows_tile, _round_up(max(R, 1), sub))
    grid_m = pl.cdiv(R, tm)                 # no host-side pad; boundary masked

    # --- output (N): lane-dense, weight-resident when it fits ----------------
    H_pad = _round_up(H, 128)
    xb = jnp.dtype(x2.dtype).itemsize
    wb = jnp.dtype(mxu_dtype).itemsize
    ob = jnp.dtype(out_dtype).itemsize

    def vmem_need(tn_):
        return (2 * tm * D * xb             # x tile (double-buffered)
                + 2 * D * tn_ * wb          # weight tile (double-buffered)
                + 2 * tm * tn_ * ob         # output tile (double-buffered)
                + tm * D * wb               # normed-x scratch
                + 4 * D * 4 + 2 * tn_ * 4)  # gamma / beta / bias

    if vmem_need(H_pad) <= budget:
        tn = H_pad                          # whole weight resident, single j step
    else:
        tn = 128
        for cand in (1024, 512, 256):
            if H_pad % cand == 0 and vmem_need(cand) <= budget:
                tn = cand
                break
    grid_n = H_pad // tn

    # Host-side prep: cast weight to MXU dtype once, lane-pad H once.
    wk = w.astype(mxu_dtype)
    bk = b.astype(jnp.float32)
    if H_pad != H:
        wk = jnp.pad(wk, ((0, 0), (0, H_pad - H)))
        bk = jnp.pad(bk, (0, H_pad - H))
    g2 = gamma.astype(jnp.float32).reshape(1, D)
    bt2 = beta.astype(jnp.float32).reshape(1, D)
    b2 = bk.reshape(1, H_pad)

    kernel = functools.partial(_fused_norm_linear_kernel, eps=eps,
                               apply_norm=apply_norm, mxu_dtype=mxu_dtype)
    out = pl.pallas_call(
        kernel,
        out_shape=jax.ShapeDtypeStruct((R, H_pad), out_dtype),
        grid_spec=pltpu.PrefetchScalarGridSpec(
            num_scalar_prefetch=0,
            grid=(grid_m, grid_n),
            in_specs=[
                pl.BlockSpec((tm, D), lambda i, j: (i, 0)),   # x tile (j-invariant)
                pl.BlockSpec((1, D), lambda i, j: (0, 0)),    # gamma
                pl.BlockSpec((1, D), lambda i, j: (0, 0)),    # beta
                pl.BlockSpec((D, tn), lambda i, j: (0, j)),   # weight column tile
                pl.BlockSpec((1, tn), lambda i, j: (0, j)),   # bias tile
            ],
            out_specs=pl.BlockSpec((tm, tn), lambda i, j: (i, j)),
            scratch_shapes=[pltpu.VMEM((tm, D), mxu_dtype)],  # normed-x cache
        ),
        compiler_params=pltpu.CompilerParams(
            # Only the row axis is parallel (v7x TCs shard rows); j is
            # sequential so the per-row norm cache stays valid.
            dimension_semantics=("parallel", "arbitrary"),
            vmem_limit_bytes=vmem_limit,
        ),
    )(x2, g2, bt2, wk, b2)
    if H_pad != H:
        out = out[:, :H]
    return out


def prenorm_linear(x2, gamma, beta, w, b, *, eps=1e-5):
    """Fused LayerNorm(D) + Linear(D->H) in one kernel (no HBM round trip)."""
    return _norm_linear(x2, gamma, beta, w, b, eps=eps, apply_norm=True)


def linear(x2, w, b):
    """Plain Linear(D->H) kernel (no norm), same MXU-shaped tiling."""
    D = x2.shape[1]
    dummy = jnp.zeros((D,), jnp.float32)
    return _norm_linear(x2, dummy, dummy, w, b, apply_norm=False)


# ----------------------------------------------------------------------------
# Standalone LayerNorm kernel (general PreNorm path for arbitrary `fn`)
# ----------------------------------------------------------------------------
def _layernorm_kernel(x_ref, g_ref, bt_ref, o_ref, *, eps):
    x = x_ref[...].astype(jnp.float32)                            # (tm, D)
    mean = jnp.mean(x, axis=-1, keepdims=True)
    xc = x - mean
    var = jnp.mean(xc * xc, axis=-1, keepdims=True)
    y = xc * jax.lax.rsqrt(var + eps)
    y = y * g_ref[...].astype(jnp.float32) + bt_ref[...].astype(jnp.float32)
    o_ref[...] = y.astype(o_ref.dtype)


def layernorm(x2, gamma, beta, *, eps=1e-5, rows_tile=None):
    """x2: (R, D) -> (R, D); normalizes over last axis. Works for any R."""
    R, D = x2.shape
    vmem_limit = _vmem_limit_bytes()
    budget = int(vmem_limit * 0.7)
    sub = _sublane_multiple(x2.dtype)
    if rows_tile is None:
        rows_tile = 1024 if budget >= (64 << 20) else 512
    tm = min(rows_tile, _round_up(max(R, 1), sub))
    xb = jnp.dtype(x2.dtype).itemsize
    # Shrink tile if 2x double-buffered in/out tiles would blow the budget.
    while tm > sub and (4 * tm * D * xb + tm * D * 4) > budget:
        tm = _round_up(tm // 2, sub)
    grid_m = pl.cdiv(R, tm)                 # no host-side pad / output slice

    out = pl.pallas_call(
        functools.partial(_layernorm_kernel, eps=eps),
        out_shape=jax.ShapeDtypeStruct((R, D), x2.dtype),
        grid_spec=pltpu.PrefetchScalarGridSpec(
            num_scalar_prefetch=0,
            grid=(grid_m,),
            in_specs=[
                pl.BlockSpec((tm, D), lambda i: (i, 0)),
                pl.BlockSpec((1, D), lambda i: (0, 0)),
                pl.BlockSpec((1, D), lambda i: (0, 0)),
            ],
            out_specs=pl.BlockSpec((tm, D), lambda i: (i, 0)),
        ),
        compiler_params=pltpu.CompilerParams(
            dimension_semantics=("parallel",),
            vmem_limit_bytes=vmem_limit,
        ),
    )(x2, gamma.astype(jnp.float32).reshape(1, D),
      beta.astype(jnp.float32).reshape(1, D))
    return out


# ----------------------------------------------------------------------------
# Module wrappers
# ----------------------------------------------------------------------------
class PallasLinear:
    """A Linear(D -> H) whose parameters the fused PreNorm path can consume."""

    def __init__(self, w, b):
        self.w = w
        self.b = b

    def __call__(self, y):
        lead = y.shape[:-1]
        out = linear(y.reshape(-1, y.shape[-1]), self.w, self.b)
        return out.reshape(lead + (out.shape[-1],))


class PreNorm:
    """fn(LayerNorm(dim)(x), **kwargs) — fuses norm+linear when fn is PallasLinear."""

    def __init__(self, dim, fn):
        self.dim = dim
        self.fn = fn
        # nn.LayerNorm defaults: weight=1, bias=0, eps=1e-5
        self.gamma = jnp.ones((dim,), jnp.float32)
        self.beta = jnp.zeros((dim,), jnp.float32)
        self.eps = 1e-5

    def __call__(self, x, **kwargs):
        D = x.shape[-1]
        assert D == self.dim
        lead = x.shape[:-1]
        x2 = x.reshape(-1, D)
        if isinstance(self.fn, PallasLinear) and not kwargs:
            # Fused path: norm + matmul in one kernel (no HBM round trip).
            out2 = prenorm_linear(x2, self.gamma, self.beta,
                                  self.fn.w, self.fn.b, eps=self.eps)
            return out2.reshape(lead + (out2.shape[-1],))
        # General path: standalone LayerNorm kernel, then arbitrary fn.
        # TODO(synk): arbitrary `fn` bodies stay as plain JAX (not fused).
        normed = layernorm(x2, self.gamma, self.beta, eps=self.eps)
        return self.fn(normed.reshape(lead + (D,)), **kwargs)


if __name__ == "__main__":
    key = jax.random.PRNGKey(0)
    k_x, k_w, k_b = jax.random.split(key, 3)

    # Small, lane-dense shapes (D, H multiples of 128).
    B, N, D, H = 2, 16, 128, 256
    x = jax.random.normal(k_x, (B, N, D), dtype=jnp.float32)
    w = jax.random.normal(k_w, (D, H), dtype=jnp.float32) * 0.02
    b = jax.random.normal(k_b, (H,), dtype=jnp.float32) * 0.02

    # Pure-JAX reference for LayerNorm
    mean = jnp.mean(x, axis=-1, keepdims=True)
    var = jnp.mean((x - mean) ** 2, axis=-1, keepdims=True)
    normed_ref = (x - mean) / jnp.sqrt(var + 1e-5)

    # 1) Fused PreNorm + Linear path (bf16 MXU -> slightly looser tolerance).
    prenorm_fused = PreNorm(D, PallasLinear(w, b))
    out_fused = jax.block_until_ready(prenorm_fused(x))
    ref_fused = jnp.einsum("bnd,dh->bnh", normed_ref, w) + b
    assert out_fused.shape == (B, N, H)
    assert jnp.allclose(out_fused, ref_fused, atol=2e-2, rtol=2e-2), \
        float(jnp.max(jnp.abs(out_fused - ref_fused)))

    # 2) General PreNorm path (arbitrary fn -> standalone LayerNorm kernel).
    #    Odd row count (2*13 = 26) exercises the masked boundary tile.
    x_odd = x[:, :13, :]
    prenorm_general = PreNorm(D, lambda y: y * 2.0)
    out_general = jax.block_until_ready(prenorm_general(x_odd))
    ref_general = normed_ref[:, :13, :] * 2.0
    assert out_general.shape == (B, 13, D)
    assert jnp.allclose(out_general, ref_general, atol=1e-3, rtol=1e-3)

    print("KERNEL_OK")
</pallas_src>

<mosaic_0001>
module attributes {stable_mosaic.version = 11 : i64} {
  func.func @_fused_norm_linear_kernel(%arg0: i32, %arg1: i32, %arg2: memref<32x128xf32, #tpu.memory_space<vmem>>, %arg3: memref<1x128xf32, #tpu.memory_space<vmem>>, %arg4: memref<1x128xf32, #tpu.memory_space<vmem>>, %arg5: memref<128x256xbf16, #tpu.memory_space<vmem>>, %arg6: memref<1x256xf32, #tpu.memory_space<vmem>>, %arg7: memref<32x256xf32, #tpu.memory_space<vmem>>, %arg8: memref<32x128xbf16, #tpu.memory_space<vmem>>) attributes {dimension_semantics = [#tpu.dimension_semantics<parallel>, #tpu.dimension_semantics<arbitrary>], iteration_bounds = array<i64: 1, 1>, scalar_prefetch = 0 : i64, scratch_operands = 1 : i64, tpu.core_type = #tpu.core_type<tc>, window_params = [{transform_indices = @transform_0, window_bounds = array<i64: 32, 128>}, {pipeline_mode = #tpu.pipeline_mode<synchronous>, transform_indices = @transform_1, window_bounds = array<i64: 1, 128>}, {pipeline_mode = #tpu.pipeline_mode<synchronous>, transform_indices = @transform_2, window_bounds = array<i64: 1, 128>}, {transform_indices = @transform_3, window_bounds = array<i64: 128, 256>}, {transform_indices = @transform_4, window_bounds = array<i64: 1, 256>}, {transform_indices = @transform_5, window_bounds = array<i64: 32, 256>}]} {
    %c0_i32 = arith.constant 0 : i32
    %0 = arith.cmpi eq, %arg1, %c0_i32 : i32
    %1 = arith.extui %0 : i1 to i32
    %c0_i32_0 = arith.constant 0 : i32
    %2 = arith.cmpi ne, %1, %c0_i32_0 : i32
    scf.if %2 {
      %c0_8 = arith.constant 0 : index
      %c0_9 = arith.constant 0 : index
      %10 = vector.load %arg2[%c0_8, %c0_9] : memref<32x128xf32, #tpu.memory_space<vmem>>, vector<32x128xf32>
      %cst_10 = arith.constant dense<0.000000e+00> : vector<32xf32>
      %11 = vector.multi_reduction <add>, %10, %cst_10 [1] : vector<32x128xf32> to vector<32xf32>
      %12 = vector.shape_cast %11 : vector<32xf32> to vector<32x1xf32>
      %cst_11 = arith.constant 1.280000e+02 : f32
      %13 = vector.broadcast %cst_11 : f32 to vector<32x1xf32>
      %14 = arith.divf %12, %13 : vector<32x1xf32>
      %15 = vector.broadcast %14 : vector<32x1xf32> to vector<32x128xf32>
      %16 = arith.subf %10, %15 : vector<32x128xf32>
      %17 = arith.mulf %16, %16 : vector<32x128xf32>
      %cst_12 = arith.constant dense<0.000000e+00> : vector<32xf32>
      %18 = vector.multi_reduction <add>, %17, %cst_12 [1] : vector<32x128xf32> to vector<32xf32>
      %19 = vector.shape_cast %18 : vector<32xf32> to vector<32x1xf32>
      %cst_13 = arith.constant 1.280000e+02 : f32
      %20 = vector.broadcast %cst_13 : f32 to vector<32x1xf32>
      %21 = arith.divf %19, %20 : vector<32x1xf32>
      %cst_14 = arith.constant 9.99999974E-6 : f32
      %22 = vector.broadcast %cst_14 : f32 to vector<32x1xf32>
      %23 = arith.addf %21, %22 : vector<32x1xf32>
      %24 = math.rsqrt %23 : vector<32x1xf32>
      %25 = vector.broadcast %24 : vector<32x1xf32> to vector<32x128xf32>
      %26 = arith.mulf %16, %25 : vector<32x128xf32>
      %c0_15 = arith.constant 0 : index
      %c0_16 = arith.constant 0 : index
      %27 = vector.load %arg3[%c0_15, %c0_16] : memref<1x128xf32, #tpu.memory_space<vmem>>, vector<1x128xf32>
      %28 = vector.broadcast %27 : vector<1x128xf32> to vector<32x128xf32>
      %29 = arith.mulf %26, %28 : vector<32x128xf32>
      %c0_17 = arith.constant 0 : index
      %c0_18 = arith.constant 0 : index
      %30 = vector.load %arg4[%c0_17, %c0_18] : memref<1x128xf32, #tpu.memory_space<vmem>>, vector<1x128xf32>
      %31 = vector.broadcast %30 : vector<1x128xf32> to vector<32x128xf32>
      %32 = arith.addf %29, %31 : vector<32x128xf32>
      %33 = arith.truncf %32 : vector<32x128xf32> to vector<32x128xbf16>
      %c0_19 = arith.constant 0 : index
      %c0_20 = arith.constant 0 : index
      %34 = vector.load %arg8[%c0_19, %c0_20] : memref<32x128xbf16, #tpu.memory_space<vmem>>, vector<32x128xbf16>
      tpu.vector_store %arg8[%c0_19, %c0_20], %33 {strides = array<i32>} : memref<32x128xbf16, #tpu.memory_space<vmem>>, vector<32x128xbf16>,
    } else {
    }
    %c0 = arith.constant 0 : index
    %c0_1 = arith.constant 0 : index
    %3 = vector.load %arg8[%c0, %c0_1] : memref<32x128xbf16, #tpu.memory_space<vmem>>, vector<32x128xbf16>
    %c0_2 = arith.constant 0 : index
    %c0_3 = arith.constant 0 : index
    %4 = vector.load %arg5[%c0_2, %c0_3] : memref<128x256xbf16, #tpu.memory_space<vmem>>, vector<128x256xbf16>
    %cst = arith.constant dense<0.000000e+00> : vector<32x256xf32>
    %5 = tpu.matmul %3, %4, %cst {dimension_numbers = #tpu.dot_dimension_numbers<[1], [0], [0], [1], [0, 0, 1, 1], [], []>} : vector<32x128xbf16>, vector<128x256xbf16>, vector<32x256xf32> -> vector<32x256xf32>
    %c0_4 = arith.constant 0 : index
    %c0_5 = arith.constant 0 : index
    %6 = vector.load %arg6[%c0_4, %c0_5] : memref<1x256xf32, #tpu.memory_space<vmem>>, vector<1x256xf32>
    %7 = vector.broadcast %6 : vector<1x256xf32> to vector<32x256xf32>
    %8 = arith.addf %5, %7 : vector<32x256xf32>
    %c0_6 = arith.constant 0 : index
    %c0_7 = arith.constant 0 : index
    %9 = vector.load %arg7[%c0_6, %c0_7] : memref<32x256xf32, #tpu.memory_space<vmem>>, vector<32x256xf32>
    tpu.vector_store %arg7[%c0_6, %c0_7], %8 {strides = array<i32>} : memref<32x256xf32, #tpu.memory_space<vmem>>, vector<32x256xf32>,
    return
  }
  func.func @transform_0(%arg0: i32, %arg1: i32) -> (i32, i32) {
    %c0_i32 = arith.constant 0 : i32
    %c0_i32_0 = arith.constant 0 : i32
    return %arg0, %c0_i32 : i32, i32
  }
  func.func @transform_1(%arg0: i32, %arg1: i32) -> (i32, i32) {
    %c0_i32 = arith.constant 0 : i32
    %c0_i32_0 = arith.constant 0 : i32
    %c0_i32_1 = arith.constant 0 : i32
    return %c0_i32, %c0_i32_0 : i32, i32
  }
  func.func @transform_2(%arg0: i32, %arg1: i32) -> (i32, i32) {
    %c0_i32 = arith.constant 0 : i32
    %c0_i32_0 = arith.constant 0 : i32
    %c0_i32_1 = arith.constant 0 : i32
    return %c0_i32, %c0_i32_0 : i32, i32
  }
  func.func @transform_3(%arg0: i32, %arg1: i32) -> (i32, i32) {
    %c0_i32 = arith.constant 0 : i32
    %c0_i32_0 = arith.constant 0 : i32
    return %c0_i32, %arg1 : i32, i32
  }
  func.func @transform_4(%arg0: i32, %arg1: i32) -> (i32, i32) {
    %c0_i32 = arith.constant 0 : i32
    %c0_i32_0 = arith.constant 0 : i32
    return %c0_i32, %arg1 : i32, i32
  }
  func.func @transform_5(%arg0: i32, %arg1: i32) -> (i32, i32) {
    %c0_i32 = arith.constant 0 : i32
    return %arg0, %arg1 : i32, i32
  }
}

</mosaic_0001>

<bundles_post_ra>
// kernel: tpu_custom_call.1
= control target key start
LH: loop header
LB: loop body
LE: loop exit
PB: predicated region body
PF: predicated region fallthrough
CT: control target
= control target key end

     0   :  { %10 = vsyncpa [#allocation4], 0  ;;  %s567_s0 = inlined_call_operand.hbm [shape: f32[32,128], index: 0, kind: input, shape index: {}]   ;;  %s568_s1 = inlined_call_operand.vmem [shape: f32[1,128], index: 1, kind: input, shape index: {}]   ;;  %s569_s2 = inlined_call_operand.vmem [shape: f32[1,128], index: 2, kind: input, shape index: {}]   ;;  %s570_s3 = inlined_call_operand.hbm [shape: bf16[128,256], index: 3, kind: input, shape index: {}]   ;;  %s571_s4 = inlined_call_operand.vmem [shape: f32[1,256], index: 4, kind: input, shape index: {}]   ;;  %s572_s5 = inlined_call_operand.hbm [shape: f32[32,256], index: 5, kind: output, shape index: {}]  }
   0x1   :  { %11 = vsyncpa [#allocation7], 0 }
   0x2   :  { %12 = vsyncpa [#allocation5], 0  ;;  %s464_s18 = smov [#allocation3]   ;;  %s392_s22 = scalar_lea.hbm %s567_s0, 512 }
   0x3   :  { %s18_s19 = sshll.u32 %s464_s18, 4  ;;  %p393_p0 = scmp.ne.s32.totalorder %s567_s0, %s392_s22  ;;  %s19_s19 = int_to_ptr.vmem [resolvable:$true] %s18_s19 }
   0x4   :  { %p396_p1 = scmp.lt.u32.totalorder %s392_s22, %s567_s0 }
   0x6   :  { %p398_p2 = pnand %p396_p1, %p393_p0 }
   0x8   :  { %401 = shalt.err (!%p398_p2)
}
   0x9   :  { %s402_s27 = scalar_lea.vmem %s19_s19, 512  ;;  %p407_p4 = scmp.lt.s32.totalorder %s19_s19, %s19_s19 }
   0xa   :  { %p403_p3 = scmp.ne.s32.totalorder %s19_s19, %s402_s27  ;;  %p408_p5 = scmp.lt.s32.totalorder %s402_s27, %s402_s27 }
   0xc   :  { %p409_p6 = por %p408_p5, %p407_p4 }
   0xe   :  { %p410_p7 = pnand %p409_p6, %p403_p3 }
  0x10   :  { %413 = shalt.err (!%p410_p7)
}
  0x11   :  { %s465_s28 = smov 128   ;;  %s466_s29 = smov 8  }
  0x12   :  { %24 = dma.hbm_to_vmem [thread:$0]  %s567_s0, 512, %s19_s19, [#allocation4], %s465_s28, %s465_s28, %s466_s29  }
  0x13   :  { %s467_s7 = smov [#allocation6]   ;;  %s414_s11 = scalar_lea.hbm %s570_s3, 2048 }
  0x14   :  { %s34_s8 = sshll.u32 %s467_s7, 4  ;;  %p415_p8 = scmp.ne.s32.totalorder %s570_s3, %s414_s11  ;;  %s35_s8 = int_to_ptr.vmem [resolvable:$true] %s34_s8 }
  0x15   :  { %p418_p9 = scmp.lt.u32.totalorder %s414_s11, %s570_s3 }
  0x17   :  { %p420_p10 = pnand %p418_p9, %p415_p8 }
  0x19   :  { %423 = shalt.err (!%p420_p10)
}
  0x1a   :  { %s424_s16 = scalar_lea.vmem %s35_s8, 2048  ;;  %p429_p12 = scmp.lt.s32.totalorder %s35_s8, %s35_s8 }
  0x1b   :  { %p425_p11 = scmp.ne.s32.totalorder %s35_s8, %s424_s16  ;;  %p430_p13 = scmp.lt.s32.totalorder %s424_s16, %s424_s16 }
  0x1d   :  { %p431_p0 = por %p430_p13, %p429_p12 }
  0x1f   :  { %p432_p1 = pnand %p431_p0, %p425_p11 }
  0x21   :  { %435 = shalt.err (!%p432_p1)
}
  0x22   :  { %40 = dma.hbm_to_vmem [thread:$0]  %s570_s3, 2048, %s35_s8, [#allocation7], %s465_s28, %s465_s28, %s466_s29  }
  0x23   :  { %458 = dma.done.wait [#allocation4], 512  }
  0x24   :  { %459 = vsyncadd [#allocation4], 4294966784 }
  0x25   :  { %460 = dma.done.wait [#allocation7], 2048  }
  0x26   :  { %461 = vsyncadd [#allocation7], 4294965248  ;;  %v54_v0 = vld [vmem:[#allocation3] sm:$0xff]  ;;  %v56_v1 = vld [vmem:[#allocation3 + $0x10] sm:$0xff]  ;;  %v468_v33 = vmov 0   ;;  %s469_s21 = smov [#allocation8]  }
  0x27   :  { %v55_v2 = vld [vmem:[#allocation3 + $0x8] sm:$0xff]  ;;  %58 = vadd.xlane.f32.xlu0 %v54_v0  ;;  %62 = vadd.xlane.f32.xlu1 %v56_v1  ;;  %v57_v3 = vld [vmem:[#allocation3 + $0x18] sm:$0xff]  ;;  %v318_v51 = vld [vmem:[%s568_s1] ss:$0 sm:$0xff]  ;;  %s305_s22 = sshll.u32 %s469_s21, 4  ;;  %s306_s22 = int_to_ptr.vmem [resolvable:$true] %s305_s22 }
  0x28   :  { %v360_v4 = vld [vmem:[#allocation6 + $0x4] ss:$8 sps:$4 sm:$0xff]   ;;  %v362_v5 = vld [vmem:[#allocation6] ss:$8 sps:$4 sm:$0xff]   ;;  %v363_v6 = vld [vmem:[#allocation6 + $0x14] ss:$8 sps:$4 sm:$0xff]   ;;  %271 = vmatprep.mubr.bf16.mxu0 %v468_v33  ;;  %281 = vmatprep.mubr.bf16.mxu1 %v468_v33  ;;  %p441_p3 = scmp.lt.s32.totalorder %s306_s22, %s306_s22 }
  0x29   :  { %239 = vmatprep.subr.bf16.mxu0 %v360_v4  ;;  %336 = vmatprep.subr.bf16.mxu1 %v360_v4  ;;  %v365_v23 = vld [vmem:[#allocation6 + $0x10] ss:$8 sps:$4 sm:$0xff]   ;;  %v366_v24 = vld [vmem:[#allocation6 + $0x24] ss:$8 sps:$4 sm:$0xff]   ;;  %v368_v25 = vld [vmem:[#allocation6 + $0x20] ss:$8 sps:$4 sm:$0xff]  }
  0x2a   :  { %240 = vmatpush1.bf16.msra.mxu0 %v362_v5  ;;  %344 = vmatpush1.bf16.msra.mxu1 %v362_v5  ;;  %v369_v26 = vld [vmem:[#allocation6 + $0x34] ss:$8 sps:$4 sm:$0xff]   ;;  %v371_v27 = vld [vmem:[#allocation6 + $0x30] ss:$8 sps:$4 sm:$0xff]   ;;  %v372_v28 = vld [vmem:[#allocation6 + $0x44] ss:$8 sps:$4 sm:$0xff]   ;;  %v149_v5 = vlaneseq }
  0x2b   :  { %60 = vadd.xlane.f32.xlu0 %v55_v2  ;;  %64 = vadd.xlane.f32.xlu1 %v57_v3  ;;  %v374_v29 = vld [vmem:[#allocation6 + $0x40] ss:$8 sps:$4 sm:$0xff]   ;;  %v375_v30 = vld [vmem:[#allocation6 + $0x54] ss:$8 sps:$4 sm:$0xff]   ;;  %v377_v31 = vld [vmem:[#allocation6 + $0x50] ss:$8 sps:$4 sm:$0xff]  }
  0x2c   :  { %241 = vmatprep.subr.bf16.mxu0 %v363_v6  ;;  %337 = vmatprep.subr.bf16.mxu1 %v363_v6  ;;  %v378_v32 = vld [vmem:[#allocation6 + $0x64] ss:$8 sps:$4 sm:$0xff]   ;;  %v380_v34 = vld [vmem:[#allocation6 + $0x60] ss:$8 sps:$4 sm:$0xff]   ;;  %v381_v35 = vld [vmem:[#allocation6 + $0x74] ss:$8 sps:$4 sm:$0xff]  }
  0x2d   :  { %v383_v36 = vld [vmem:[#allocation6 + $0x70] ss:$8 sps:$4 sm:$0xff]   ;;  %v319_v56 = vld [vmem:[%s569_s2] ss:$0 sm:$0xff]  ;;  %v150_v6 = vshrl.u32 %v149_v5, 7 }
  0x2e   :  { %242 = vmatpush1.bf16.msra.mxu0 %v365_v23  ;;  %345 = vmatpush1.bf16.msra.mxu1 %v365_v23 }
  0x2f   :  { %243 = vmatprep.subr.bf16.mxu0 %v366_v24  ;;  %338 = vmatprep.subr.bf16.mxu1 %v366_v24 }
  0x32   :  { %244 = vmatpush1.bf16.msra.mxu0 %v368_v25  ;;  %346 = vmatpush1.bf16.msra.mxu1 %v368_v25 }
  0x33   :  { %245 = vmatprep.subr.bf16.mxu0 %v369_v26  ;;  %339 = vmatprep.subr.bf16.mxu1 %v369_v26 }
  0x36   :  { %246 = vmatpush1.bf16.msra.mxu0 %v371_v27  ;;  %347 = vmatpush1.bf16.msra.mxu1 %v371_v27 }
  0x37   :  { %247 = vmatprep.subr.bf16.mxu0 %v372_v28  ;;  %340 = vmatprep.subr.bf16.mxu1 %v372_v28 }
  0x3a   :  { %248 = vmatpush1.bf16.msra.mxu0 %v374_v29  ;;  %348 = vmatpush1.bf16.msra.mxu1 %v374_v29 }
  0x3b   :  { %249 = vmatprep.subr.bf16.mxu0 %v375_v30  ;;  %341 = vmatprep.subr.bf16.mxu1 %v375_v30 }
  0x3e   :  { %250 = vmatpush1.bf16.msra.mxu0 %v377_v31  ;;  %349 = vmatpush1.bf16.msra.mxu1 %v377_v31 }
  0x3f   :  { %251 = vmatprep.subr.bf16.mxu0 %v378_v32  ;;  %342 = vmatprep.subr.bf16.mxu1 %v378_v32 }
  0x42   :  { %252 = vmatpush1.bf16.msra.mxu0 %v380_v34  ;;  %350 = vmatpush1.bf16.msra.mxu1 %v380_v34 }
  0x43   :  { %253 = vmatprep.subr.bf16.mxu0 %v381_v35  ;;  %343 = vmatprep.subr.bf16.mxu1 %v381_v35 }
  0x46   :  { %254 = vmatpush1.bf16.msra.mxu0 %v383_v36  ;;  %351 = vmatpush1.bf16.msra.mxu1 %v383_v36 }
  0xb4   :  { %v59_v7 = vpop.xlane.xlu0 %58  ;;  %v63_v8 = vpop.xlane.xlu1 %62 }
  0xb5   :  { %v67_v9 = vmul.f32 0.0078125, %v59_v7  ;;  %v69_v10 = vmul.f32 0.0078125, %v63_v8  ;;  %v151_v7 = vsub.s32 0, %v150_v6  ;;  %v147_v8 = vld [vmem:[%s571_s4] sm:$0x3]  ;;  %s436_s4 = scalar_lea.vmem %s306_s22, 1024 }
  0xb6   :  { %p437_p2 = scmp.ne.s32.totalorder %s306_s22, %s436_s4  ;;  %p442_p4 = scmp.lt.s32.totalorder %s436_s4, %s436_s4 }
  0xb7   :  { %v526_v11 = vsub.f32 %v54_v0, %v67_v9  ;;  %v528_v12 = vsub.f32 %v56_v1, %v69_v10  ;;  %v155_v9 = vsub.s32 1, %v150_v6  ;;  %v152_v10 = vrot.slane %v147_v8, %v151_v7 }
  0xb8   :  { %v61_v13 = vpop.xlane.xlu0 %60  ;;  %v65_v14 = vpop.xlane.xlu1 %64  ;;  %p443_p5 = por %p442_p4, %p441_p3 }
  0xb9   :  { %v68_v15 = vmul.f32 0.0078125, %v61_v13  ;;  %v75_v16 = vmul.f32 %v526_v11, %v526_v11  ;;  %v70_v17 = vmul.f32 0.0078125, %v65_v14  ;;  %v77_v20 = vmul.f32 %v528_v12, %v528_v12 }
  0xba   :  { %p444_p6 = pnand %p443_p5, %p437_p2 }
  0xbb   :  { %v532_v18 = vsub.f32 %v55_v2, %v68_v15  ;;  %79 = vadd.xlane.f32.xlu0 %v75_v16  ;;  %v534_v19 = vsub.f32 %v57_v3, %v70_v17 }
  0xbd   :  { %v76_v21 = vmul.f32 %v532_v18, %v532_v18  ;;  %v78_v22 = vmul.f32 %v534_v19, %v534_v19 }
  0xbf   :  { %83 = vadd.xlane.f32.xlu0 %v77_v20  ;;  %81 = vadd.xlane.f32.xlu1 %v76_v21 }
  0xc3   :  { %85 = vadd.xlane.f32.xlu1 %v78_v22 }
 0x148   :  { %v80_v37 = vpop.xlane.xlu0 %79 }
 0x149   :  { %v87_v38 = vmul.f32 0.0078125, %v80_v37 }
 0x14b   :  { %v91_v39 = vadd.f32 1e-05, %v87_v38 }
 0x14c   :  { %v82_v40 = vpop.xlane.xlu1 %81  ;;  %v84_v41 = vpop.xlane.xlu0 %83 }
 0x14d   :  { %384 = vrsqrt.f32 %v91_v39  ;;  %v88_v42 = vmul.f32 0.0078125, %v82_v40  ;;  %v89_v43 = vmul.f32 0.0078125, %v84_v41 }
 0x14f   :  { %v92_v44 = vadd.f32 1e-05, %v88_v42  ;;  %v93_v45 = vadd.f32 1e-05, %v89_v43 }
 0x150   :  { %v86_v46 = vpop.xlane.xlu1 %85 }
 0x151   :  { %386 = vrsqrt.f32 %v92_v44  ;;  %v90_v47 = vmul.f32 0.0078125, %v86_v46 }
 0x152   :  { %388 = vrsqrt.f32 %v93_v45 }
 0x153   :  { %v94_v48 = vadd.f32 1e-05, %v90_v47 }
 0x155   :  { %390 = vrsqrt.f32 %v94_v48 }
 0x157   :  { %v385_v49 = vpop.eup %384 }
 0x158   :  { %v99_v50 = vmul.f32 %v385_v49, %v526_v11  ;;  %v156_v11 = vrot.slane %v147_v8, %v155_v9 }
 0x15a   :  { %v110_v55 = vmul.f32 %v318_v51, %v99_v50 }
 0x15b   :  { %v387_v52 = vpop.eup %386 }
 0x15c   :  { %v389_v53 = vpop.eup %388  ;;  %v100_v54 = vmul.f32 %v387_v52, %v532_v18  ;;  %v121_v60 = vadd.f32 %v319_v56, %v110_v55 }
 0x15d   :  { %v101_v57 = vmul.f32 %v389_v53, %v528_v12 }
 0x15e   :  { %v111_v58 = vmul.f32 %v318_v51, %v100_v54 }
 0x15f   :  { %v391_v59 = vpop.eup %390  ;;  %v112_v63 = vmul.f32 %v318_v51, %v101_v57 }
 0x160   :  { %v122_v61 = vadd.f32 %v319_v56, %v111_v58  ;;  %v102_v62 = vmul.f32 %v391_v59, %v534_v19 }
 0x161   :  { %v123_v2 = vadd.f32 %v319_v56, %v112_v63 }
 0x162   :  { %v125_v0 = vpack.c.bf16 %v122_v61, %v121_v60  ;;  %v113_v1 = vmul.f32 %v318_v51, %v102_v62 }
 0x164   :  { %272 = vmatmul.mubr.bf16.vlgmr.msra.gmra.mrb[0].mxu0 %v125_v0  ;;  %v124_v3 = vadd.f32 %v319_v56, %v113_v1 }
 0x166   :  { %v126_v4 = vpack.c.bf16 %v124_v3, %v123_v2 }
 0x168   :  { %282 = vmatmul.mubr.bf16.vlgmr.msra.gmra.mrb[0].mxu1 %v126_v4 }
 0x237   :  { %v273_v12 = vpop.f32.mrb[0].mxu0 }
 0x238   :  { %v274_v13 = vadd.f32 %v273_v12, %v152_v10  ;;  %v275_v14 = vpop.f32.mrb[1].mxu0 }
 0x239   :  { %v276_v15 = vadd.f32 %v275_v14, %v156_v11  ;;  %v277_v16 = vpop.f32.mrb[2].mxu0 }
 0x23a   :  { %292 = vst [vmem:[#allocation8] sm:$0xff] %v274_v13  ;;  %v278_v17 = vadd.f32 %v277_v16, %v152_v10  ;;  %v279_v18 = vpop.f32.mrb[3].mxu0 }
 0x23b   :  { %293 = vst [vmem:[#allocation8 + $0x8] sm:$0xff] %v276_v15  ;;  %v280_v19 = vadd.f32 %v279_v18, %v156_v11  ;;  %v283_v20 = vpop.f32.mrb[0].mxu1 }
 0x23c   :  { %294 = vst [vmem:[#allocation8 + $0x10] sm:$0xff] %v278_v17  ;;  %v284_v21 = vadd.f32 %v283_v20, %v152_v10  ;;  %v285_v22 = vpop.f32.mrb[1].mxu1 }
 0x23d   :  { %295 = vst [vmem:[#allocation8 + $0x18] sm:$0xff] %v280_v19  ;;  %v286_v23 = vadd.f32 %v285_v22, %v156_v11  ;;  %v287_v24 = vpop.f32.mrb[2].mxu1 }
 0x23e   :  { %296 = vst [vmem:[#allocation8 + $0x20] sm:$0xff] %v284_v21  ;;  %v288_v25 = vadd.f32 %v287_v24, %v152_v10  ;;  %v289_v26 = vpop.f32.mrb[3].mxu1 }
 0x23f   :  { %297 = vst [vmem:[#allocation8 + $0x28] sm:$0xff] %v286_v23  ;;  %v290_v27 = vadd.f32 %v289_v26, %v156_v11 }
 0x240   :  { %298 = vst [vmem:[#allocation8 + $0x30] sm:$0xff] %v288_v25 }
 0x241   :  { %299 = vst [vmem:[#allocation8 + $0x38] sm:$0xff] %v290_v27 }
 0x242   :  { %447 = shalt.err (!%p444_p6)
}
 0x243   :  { %s448_s25 = scalar_lea.hbm %s572_s5, 1024 }
 0x244   :  { %p449_p7 = scmp.ne.s32.totalorder %s572_s5, %s448_s25  ;;  %p452_p8 = scmp.lt.u32.totalorder %s448_s25, %s572_s5 }
 0x246   :  { %p454_p9 = pnand %p452_p8, %p449_p7 }
 0x248   :  { %457 = shalt.err (!%p454_p9)
}
 0x249   :  { %s470_s30 = smov 256   ;;  %s471_s6 = smov 16  }
 0x24a   :  { %311 = dma.vmem_to_hbm [thread:$0]  %s306_s22, 1024, %s572_s5, [#allocation5], %s470_s30, %s470_s30, %s471_s6  }
 0x24b   :  { %462 = dma.done.wait [#allocation5], 1024  }
 0x24c   :  { %463 = vsyncadd [#allocation5], 4294966272 }
 0x24d   :  { %315 = vsyncpa [#allocation4], 1 }
 0x24e   :  { %316 = vsyncpa [#allocation7], 1 }
 0x24f   :  { %317 = vsyncpa [#allocation5], 1 }

</bundles_post_ra>
